<compile_context>
chip_gen: v5e
topology: v5e:2x2
jax: 0.10.0
libtpu: 0.0.40
codegen_flags: <defaults>
</compile_context>

<pallas_src>
import functools

import jax
import jax.numpy as jnp
from jax.experimental import pallas as pl
from jax.experimental.pallas import tpu as pltpu


def _round_up(x, m):
    return (x + m - 1) // m * m


def _round_down(x, m):
    return x // m * m


def _chip_defaults():
    """Returns (target f32 bytes per input block, scoped-VMEM cap in bytes)."""
    kind = ""
    try:
        kind = jax.devices()[0].device_kind.lower()
    except Exception:
        pass
    if "v5 lite" in kind or "v5lite" in kind or "v5e" in kind:
        return 2 << 20, 64 << 20      # v5e: 2 MiB blocks already amortize overhead
    if "v7" in kind:
        return 4 << 20, 48 << 20      # v7x: 64 MiB physical VMEM -> stay <= 48 MiB
    if "v6" in kind:
        return 4 << 20, 64 << 20      # v6e: 128 MiB physical VMEM
    return 4 << 20, 48 << 20          # unknown generation: conservative cap


def _iou_loss_kernel(logits_ref, iou_ref, valid_ref, psum_ref, *,
                     min_iou, inv_range, rows_per_block, s_total,
                     need_row_mask):
    x = logits_ref[...].astype(jnp.float32)       # (TS, M) logits
    iou = iou_ref[...].astype(jnp.float32)        # (TS, M) raw IoU targets
    valid = valid_ref[...].astype(jnp.float32)    # (1, M) or (TS, M) 0/1

    # linear_scale: ((iou - min_iou) / (max_iou - min_iou)).clamp(0, 1)
    y = jnp.clip((iou - min_iou) * inv_range, 0.0, 1.0)

    # binary_cross_entropy_with_logits, numerically stable form:
    #   max(x, 0) - x*y + log1p(exp(-|x|))
    # exactly 2 transcendentals / element (exp + log1p); keep it that way (EUP
    # is co-critical on v7x with narrow input dtypes).
    loss = jnp.maximum(x, 0.0) - x * y + jnp.log1p(jnp.exp(-jnp.abs(x)))
    loss = loss * valid

    # One cross-lane reduce per row -> (TS, 1) partial sums (tiling-legal block).
    row_sums = jnp.sum(loss, axis=1, keepdims=True)

    if need_row_mask:
        # Ragged final block: out-of-range rows hold garbage (possibly NaN), so
        # drop them with a select (NaN-safe), built from a tiny (TS, 1) iota.
        i = pl.program_id(0)
        row_ids = i * rows_per_block + jax.lax.broadcasted_iota(
            jnp.int32, (rows_per_block, 1), 0)
        row_sums = jnp.where(row_ids < s_total, row_sums, 0.0)

    psum_ref[...] = row_sums


def scaled_iou_loss_afnd(logits2d, iou2d, mask2d, false_neg_mask=None, *,
                         min_iou=0.5, max_iou=1.0, weight=1.0,
                         target_block_bytes=None):
    """JAX/Pallas equivalent of ScaledIoULossAFND.forward.

    logits2d, iou2d : (S, N, N) float (any float dtype; widened in-kernel)
    mask2d          : (N, N) bool
    false_neg_mask  : optional (S, P) bool, P = mask2d.sum()
    Returns (loss * weight, {'loss/iou': loss}).
    """
    if weight == 0:
        zero = jnp.float32(0.0)
        return zero, {"loss/iou": zero}

    assert float(max_iou) != float(min_iou), "max_iou must differ from min_iou"
    S, N, _ = logits2d.shape
    assert logits2d.shape == iou2d.shape, f"{logits2d.shape} != {iou2d.shape}"
    M = N * N

    target_default, vmem_cap = _chip_defaults()
    if target_block_bytes is None:
        target_block_bytes = target_default

    # ---- tiling: lane-dense (S, M) layout, NO wrapper-side padding ----------
    rows_cap = max(8, _round_down(target_block_bytes // (4 * M), 8))
    if S <= rows_cap:
        if S > 16:
            # Split into >= 2 blocks so the "parallel" grid axis can shard over
            # both TensorCores on v7x (harmless on single-TC v5e/v6e).
            TS = _round_up(-(-S // 2), 8)
        else:
            TS = S                      # single block; full-dim rule applies
    else:
        TS = rows_cap                   # multiple of 8
    num_blocks = -(-S // TS)
    out_rows = num_blocks * TS
    need_row_mask = (out_rows != S)

    # reshape is a free view; no pad copies.  Column masking comes from `valid`,
    # row masking (ragged last block) happens in-kernel.
    logits_flat = logits2d.reshape(S, M)
    iou_flat = iou2d.reshape(S, M)

    if false_neg_mask is None:
        # Single resident (1, M) int8 proposal-mask row, DMA'd once.
        valid = mask2d.reshape(1, M).astype(jnp.int8)
        valid_spec = pl.BlockSpec((1, M), lambda i: (0, 0))
        denom = jnp.float32(S) * jnp.sum(mask2d.astype(jnp.float32))
        valid_rows = 1
    else:
        # Dense (S, M) int8 validity built scatter-free: rank-of-True via cumsum,
        # then a gather of the keep-mask and a where against mask2d.
        P = int(false_neg_mask.shape[1])
        mask_flat = mask2d.reshape(-1)                              # (M,) bool
        col_to_p = jnp.cumsum(mask_flat.astype(jnp.int32)) - 1      # rank among Trues
        keep = jnp.logical_not(false_neg_mask)                      # (S, P) bool
        gathered = jnp.take(keep, jnp.clip(col_to_p, 0, P - 1), axis=1)  # (S, M)
        valid = jnp.where(mask_flat[None, :], gathered, False).astype(jnp.int8)
        valid_spec = pl.BlockSpec((TS, M), lambda i: (i, 0))
        denom = jnp.sum(keep.astype(jnp.float32))
        valid_rows = TS

    # VMEM budget from actual footprint: 2 double-buffered input blocks, the
    # (double-buffered) int8 validity blocks, plus f32 intermediates + slack.
    itemsize = max(jnp.dtype(logits2d.dtype).itemsize,
                   jnp.dtype(iou2d.dtype).itemsize)
    blk_in = TS * M * itemsize
    blk_f32 = TS * M * 4
    vmem_need = 2 * 2 * blk_in + 2 * valid_rows * M + 5 * blk_f32 + (2 << 20)
    vmem_limit = int(min(max(vmem_need, 32 << 20), vmem_cap))

    kernel = functools.partial(
        _iou_loss_kernel,
        min_iou=float(min_iou),
        inv_range=1.0 / (float(max_iou) - float(min_iou)),
        rows_per_block=TS,
        s_total=S,
        need_row_mask=need_row_mask)

    psums = pl.pallas_call(
        kernel,
        out_shape=jax.ShapeDtypeStruct((out_rows, 1), jnp.float32),
        grid_spec=pltpu.PrefetchScalarGridSpec(
            num_scalar_prefetch=0,
            grid=(num_blocks,),
            in_specs=[pl.BlockSpec((TS, M), lambda i: (i, 0)),
                      pl.BlockSpec((TS, M), lambda i: (i, 0)),
                      valid_spec],
            out_specs=pl.BlockSpec((TS, 1), lambda i: (i, 0)),
        ),
        compiler_params=pltpu.CompilerParams(
            dimension_semantics=("parallel",),
            vmem_limit_bytes=vmem_limit),
    )(logits_flat, iou_flat, valid)

    loss = jnp.sum(psums) / denom
    return loss * weight, {"loss/iou": loss}


def _reference_loss(logits2d, iou2d, mask2d, false_neg_mask=None,
                    *, min_iou=0.5, max_iou=1.0, weight=1.0):
    """Pure-JAX reference replicating the PyTorch forward exactly."""
    S, N, _ = logits2d.shape
    P = int(mask2d.sum())
    flat_idx = jnp.nonzero(mask2d.reshape(-1), size=P)[0]
    logits1d = logits2d.astype(jnp.float32).reshape(S, -1)[:, flat_idx]
    iou1d = iou2d.astype(jnp.float32).reshape(S, -1)[:, flat_idx]
    y = jnp.clip((iou1d - min_iou) / (max_iou - min_iou), 0.0, 1.0)
    x = logits1d
    loss = jnp.maximum(x, 0.0) - x * y + jnp.log1p(jnp.exp(-jnp.abs(x)))
    if false_neg_mask is not None:
        loss = jnp.where(false_neg_mask, 0.0, loss)
        loss = loss.sum() / jnp.sum(~false_neg_mask)
    else:
        loss = loss.mean()
    return loss * weight, loss


if __name__ == "__main__":
    min_iou, max_iou, weight = 0.5, 1.0, 1.0
    key = jax.random.PRNGKey(0)

    def make_inputs(S, N, k):
        k1, k2, k3 = jax.random.split(k, 3)
        logits2d = jax.random.normal(k1, (S, N, N), dtype=jnp.float32)
        iou2d = jax.random.uniform(k2, (S, N, N), dtype=jnp.float32)
        mask2d = jnp.triu(jnp.ones((N, N), dtype=bool))   # start <= end proposals
        P = int(mask2d.sum())
        fnm = jax.random.bernoulli(k3, 0.2, (S, P))
        return logits2d, iou2d, mask2d, fnm

    def check(S, N, use_fnm, k, target_block_bytes=None):
        logits2d, iou2d, mask2d, fnm = make_inputs(S, N, k)
        fnm_arg = fnm if use_fnm else None
        loss, logs = scaled_iou_loss_afnd(
            logits2d, iou2d, mask2d, fnm_arg,
            min_iou=min_iou, max_iou=max_iou, weight=weight,
            target_block_bytes=target_block_bytes)
        loss = jax.block_until_ready(loss)
        ref, ref_raw = _reference_loss(logits2d, iou2d, mask2d, fnm_arg,
                                       min_iou=min_iou, max_iou=max_iou,
                                       weight=weight)
        assert jnp.allclose(loss, ref, rtol=5e-5, atol=1e-6), (S, N, use_fnm, loss, ref)
        assert jnp.allclose(logs["loss/iou"], ref_raw, rtol=5e-5, atol=1e-6)

    keys = jax.random.split(key, 4)
    # case 1: small, false_neg_mask=None, single full-dim block
    check(8, 16, False, keys[0])
    # case 2: small, with false_neg_mask (streamed int8 validity), single block
    check(8, 16, True, keys[1])
    # case 3: None mask, single-block-sized S split into 2 blocks + ragged tail
    check(24, 16, False, keys[2])
    # case 4: false_neg_mask, forced small blocks -> 3 blocks, ragged last block
    check(72, 16, True, keys[3], target_block_bytes=32 * 1024)

    print("KERNEL_OK")
</pallas_src>

<mosaic_0001>
module attributes {stable_mosaic.version = 11 : i64} {
  func.func @_iou_loss_kernel(%arg0: i32, %arg1: memref<8x256xf32, #tpu.memory_space<vmem>>, %arg2: memref<8x256xf32, #tpu.memory_space<vmem>>, %arg3: memref<1x256xi8, #tpu.memory_space<vmem>>, %arg4: memref<8x1xf32, #tpu.memory_space<vmem>>) attributes {dimension_semantics = [#tpu.dimension_semantics<parallel>], iteration_bounds = array<i64: 1>, scalar_prefetch = 0 : i64, scratch_operands = 0 : i64, tpu.core_type = #tpu.core_type<tc>, window_params = [{transform_indices = @transform_0, window_bounds = array<i64: 8, 256>}, {transform_indices = @transform_1, window_bounds = array<i64: 8, 256>}, {pipeline_mode = #tpu.pipeline_mode<synchronous>, transform_indices = @transform_2, window_bounds = array<i64: 1, 256>}, {transform_indices = @transform_3, window_bounds = array<i64: 8, 1>}]} {
    %c0 = arith.constant 0 : index
    %c0_0 = arith.constant 0 : index
    %0 = vector.load %arg1[%c0, %c0_0] : memref<8x256xf32, #tpu.memory_space<vmem>>, vector<8x256xf32>
    %c0_1 = arith.constant 0 : index
    %c0_2 = arith.constant 0 : index
    %1 = vector.load %arg2[%c0_1, %c0_2] : memref<8x256xf32, #tpu.memory_space<vmem>>, vector<8x256xf32>
    %c0_3 = arith.constant 0 : index
    %c0_4 = arith.constant 0 : index
    %2 = vector.load %arg3[%c0_3, %c0_4] : memref<1x256xi8, #tpu.memory_space<vmem>>, vector<1x256xi8>
    %3 = arith.sitofp %2 : vector<1x256xi8> to vector<1x256xf32>
    %cst = arith.constant 5.000000e-01 : f32
    %4 = vector.broadcast %cst : f32 to vector<8x256xf32>
    %5 = arith.subf %1, %4 : vector<8x256xf32>
    %cst_5 = arith.constant 2.000000e+00 : f32
    %6 = vector.broadcast %cst_5 : f32 to vector<8x256xf32>
    %7 = arith.mulf %5, %6 : vector<8x256xf32>
    %cst_6 = arith.constant 0.000000e+00 : f32
    %cst_7 = arith.constant 1.000000e+00 : f32
    %8 = vector.broadcast %cst_6 : f32 to vector<8x256xf32>
    %9 = arith.maximumf %8, %7 : vector<8x256xf32>
    %10 = vector.broadcast %cst_7 : f32 to vector<8x256xf32>
    %11 = arith.minimumf %10, %9 : vector<8x256xf32>
    %cst_8 = arith.constant 0.000000e+00 : f32
    %12 = vector.broadcast %cst_8 : f32 to vector<8x256xf32>
    %13 = arith.maximumf %0, %12 : vector<8x256xf32>
    %14 = arith.mulf %0, %11 : vector<8x256xf32>
    %15 = arith.subf %13, %14 : vector<8x256xf32>
    %16 = math.absf %0 : vector<8x256xf32>
    %cst_9 = arith.constant 0.000000e+00 : f32
    %17 = vector.broadcast %cst_9 : f32 to vector<8x256xf32>
    %18 = arith.subf %17, %16 : vector<8x256xf32>
    %19 = math.exp %18 : vector<8x256xf32>
    %20 = math.log1p %19 : vector<8x256xf32>
    %21 = arith.addf %15, %20 : vector<8x256xf32>
    %22 = vector.broadcast %3 : vector<1x256xf32> to vector<8x256xf32>
    %23 = arith.mulf %21, %22 : vector<8x256xf32>
    %cst_10 = arith.constant dense<0.000000e+00> : vector<8xf32>
    %24 = vector.multi_reduction <add>, %23, %cst_10 [1] : vector<8x256xf32> to vector<8xf32>
    %25 = vector.shape_cast %24 : vector<8xf32> to vector<8x1xf32>
    %c0_11 = arith.constant 0 : index
    %c0_12 = arith.constant 0 : index
    %26 = vector.load %arg4[%c0_11, %c0_12] : memref<8x1xf32, #tpu.memory_space<vmem>>, vector<8x1xf32>
    tpu.vector_store %arg4[%c0_11, %c0_12], %25 {strides = array<i32>} : memref<8x1xf32, #tpu.memory_space<vmem>>, vector<8x1xf32>,
    return
  }
  func.func @transform_0(%arg0: i32) -> (i32, i32) {
    %c0_i32 = arith.constant 0 : i32
    %c0_i32_0 = arith.constant 0 : i32
    return %arg0, %c0_i32 : i32, i32
  }
  func.func @transform_1(%arg0: i32) -> (i32, i32) {
    %c0_i32 = arith.constant 0 : i32
    %c0_i32_0 = arith.constant 0 : i32
    return %arg0, %c0_i32 : i32, i32
  }
  func.func @transform_2(%arg0: i32) -> (i32, i32) {
    %c0_i32 = arith.constant 0 : i32
    %c0_i32_0 = arith.constant 0 : i32
    %c0_i32_1 = arith.constant 0 : i32
    return %c0_i32, %c0_i32_0 : i32, i32
  }
  func.func @transform_3(%arg0: i32) -> (i32, i32) {
    %c0_i32 = arith.constant 0 : i32
    %c0_i32_0 = arith.constant 0 : i32
    return %arg0, %c0_i32 : i32, i32
  }
}

</mosaic_0001>

<bundles_post_ra>
// kernel: tpu_custom_call.1
= control target key start
LH: loop header
LB: loop body
LE: loop exit
PB: predicated region body
PF: predicated region fallthrough
CT: control target
= control target key end

     0   :  { %8 = vsyncpa [#allocation3], 0  ;;  %s248_s0 = inlined_call_operand.hbm [shape: f32[8,256], index: 0, kind: input, shape index: {}]   ;;  %s249_s1 = inlined_call_operand.hbm [shape: f32[8,256], index: 1, kind: input, shape index: {}]   ;;  %s250_s2 = inlined_call_operand.hbm [shape: s8[1,256], index: 2, kind: input, shape index: {}]   ;;  %s251_s3 = inlined_call_operand.vmem [shape: f32[8,1], index: 3, kind: output, shape index: {}]  }
   0x1   :  { %9 = vsyncpa [#allocation5], 0  ;;  %s26_s14 = sshll.u32 %s249_s1, 4  ;;  %s213_s15 = smov [#allocation4]   ;;  %s27_s14 = int_to_ptr.hbm [resolvable:$true] %s26_s14 }
   0x2   :  { %s28_s16 = sshll.u32 %s213_s15, 4  ;;  %s15_s19 = sshll.u32 %s248_s0, 4  ;;  %s29_s16 = int_to_ptr.vmem [resolvable:$true] %s28_s16  ;;  %s16_s19 = int_to_ptr.hbm [resolvable:$true] %s15_s19 }
   0x3   :  { %31 = dma.hbm_to_vmem [thread:$0]  %s27_s14, 256, %s29_s16, [#allocation5]  }
   0x4   :  { %s214_s20 = smov [#allocation2]   ;;  %s37_s24 = sshll.u32 %s250_s2, 4  ;;  %s38_s24 = int_to_ptr.hbm [resolvable:$true] %s37_s24 }
   0x5   :  { %s17_s21 = sshll.u32 %s214_s20, 4  ;;  %s215_s1 = smov [#allocation6]   ;;  %s18_s21 = int_to_ptr.vmem [resolvable:$true] %s17_s21 }
   0x6   :  { %20 = dma.hbm_to_vmem [thread:$0]  %s16_s19, 256, %s18_s21, [#allocation3]  }
   0x7   :  { %s39_s25 = sshll.u32 %s215_s1, 4  ;;  %s40_s25 = int_to_ptr.vmem [resolvable:$true] %s39_s25 }
   0x8   :  { %42 = dma.hbm_to_vmem [thread:$0]  %s38_s24, 32, %s40_s25, [#allocation5]  }
   0x9   :  { %209 = dma.done.wait [#allocation3], 256  }
   0xa   :  { %210 = vsyncadd [#allocation3], 4294967040 }
   0xb   :  { %211 = dma.done.wait [#allocation5], 288  }
   0xc   :  { %212 = vsyncadd [#allocation5], 4294967008  ;;  %v55_v0 = vld [vmem:[#allocation2] sm:$0xff]  ;;  %v56_v1 = vld [vmem:[#allocation2 + $0x8] sm:$0xff]  ;;  %vm116_vm2 = vcmask 7168  }
   0xd   :  { %v57_v2 = vld [vmem:[#allocation4] sm:$0xff]  ;;  %v58_v3 = vld [vmem:[#allocation4 + $0x8] sm:$0xff]  ;;  %v76_v4 = vand.u32 2147483647, %v55_v0  ;;  %v77_v5 = vand.u32 2147483647, %v56_v1 }
   0xe   :  { %v124_v6 = vadd.f32 -0.5, %v57_v2  ;;  %v125_v7 = vadd.f32 -0.5, %v58_v3  ;;  %v59_v14 = vld [vmem:[#allocation6] sm:$0x3]  ;;  %v70_v28 = vmax.f32 %v55_v0, 0.0  ;;  %v71_v32 = vmax.f32 %v56_v1, 0.0 }
   0xf   :  { %v78_v8 = vsub.f32 0.0, %v76_v4  ;;  %v79_v9 = vsub.f32 0.0, %v77_v5  ;;  %v60_v17 = vunpack.c.0.s8 %v59_v14 }
  0x10   :  { %v64_v12 = vmul.f32 2.0, %v124_v6  ;;  %v65_v13 = vmul.f32 2.0, %v125_v7 }
  0x11   :  { %v80_v10 = vmul.f32 1.442695, %v78_v8  ;;  %v82_v11 = vmul.f32 1.442695, %v79_v9  ;;  %v61_v26 = vcvt.s32.f32 %v60_v17 }
  0x12   :  { %v66_v15 = vmax.f32 %v64_v12, 0.0  ;;  %v67_v16 = vmax.f32 %v65_v13, 0.0 }
  0x13   :  { %129 = vpow2.f32 %v80_v10  ;;  %v105_v35 = vperm.slane %v61_v26, 0  ;;  %v106_v37 = vperm.slane %v61_v26, 4 }
  0x14   :  { %131 = vpow2.f32 %v82_v11  ;;  %v68_v20 = vmin.f32 %v66_v15, 1.0  ;;  %v69_v23 = vmin.f32 %v67_v16, 1.0 }
  0x15   :  { %v109_v45 = vperm.slane %v105_v35, 0  ;;  %v110_v47 = vperm.slane %v106_v37, 0 }
  0x16   :  { %v72_v29 = vmul.f32 %v68_v20, %v55_v0  ;;  %v73_v33 = vmul.f32 %v69_v23, %v56_v1 }
  0x18   :  { %v74_v39 = vsub.f32 %v70_v28, %v72_v29  ;;  %v75_v42 = vsub.f32 %v71_v32, %v73_v33 }
  0x19   :  { %v130_v18 = vpop.eup %129 }
  0x1a   :  { %v132_v19 = vpop.eup %131  ;;  %v84_v21 = vadd.f32 1.0, %v130_v18  ;;  %v87_v22 = vmul.f32 -0.5, %v130_v18  ;;  %v90_v30 = vand.u32 2147483647, %v130_v18 }
  0x1b   :  { %v93_v24 = vadd.f32 1.0, %v132_v19  ;;  %v96_v25 = vmul.f32 -0.5, %v132_v19  ;;  %v99_v34 = vand.u32 2147483647, %v132_v19 }
  0x1c   :  { %133 = vlog2.f32 %v84_v21  ;;  %v88_v27 = vadd.f32 1.0, %v87_v22  ;;  %vm91_vm0 = vcmp.lt.f32.partialorder %v90_v30, 0.0004427343 }
  0x1d   :  { %135 = vlog2.f32 %v93_v24  ;;  %v97_v31 = vadd.f32 1.0, %v96_v25  ;;  %vm100_vm1 = vcmp.lt.f32.partialorder %v99_v34, 0.0004427343 }
  0x1e   :  { %v89_v36 = vmul.f32 %v130_v18, %v88_v27 }
  0x1f   :  { %v98_v40 = vmul.f32 %v132_v19, %v97_v31 }
  0x22   :  { %v134_v38 = vpop.eup %133 }
  0x23   :  { %v136_v41 = vpop.eup %135  ;;  %v86_v43 = vmul.f32 0.6931472, %v134_v38 }
  0x24   :  { %v95_v44 = vmul.f32 0.6931472, %v136_v41 }
  0x25   :  { %v92_v46 = vsel %vm91_vm0, %v89_v36, %v86_v43 }
  0x26   :  { %v101_v48 = vsel %vm100_vm1, %v98_v40, %v95_v44  ;;  %v102_v49 = vadd.f32 %v92_v46, %v74_v39 }
  0x27   :  { %v103_v50 = vadd.f32 %v101_v48, %v75_v42 }
  0x28   :  { %v111_v51 = vmul.f32 %v109_v45, %v102_v49 }
  0x29   :  { %v112_v52 = vmul.f32 %v110_v47, %v103_v50 }
  0x2b   :  { %v113_v53 = vadd.f32 %v112_v52, %v111_v51 }
  0x2d   :  { %114 = vadd.xlane.f32.xlu0 %v113_v53 }
  0xa0   :  { %v115_v54 = vpop.xlane.xlu0 %114 }
  0xa1   :  { %117 = vst.msk [vmem:[%s251_s3] sm:$0xff] %vm116_vm2, %v115_v54 }
  0xa2   :  { %122 = vsyncpa [#allocation3], 1 }
  0xa3   :  { %123 = vsyncpa [#allocation5], 1 }

</bundles_post_ra>
